<compile_context>
chip_gen: v5e
topology: v5e:2x2
jax: 0.10.0
libtpu: 0.0.40
codegen_flags: <defaults>
</compile_context>

<pallas_src>
import jax
import jax.numpy as jnp
from jax.experimental import pallas as pl
from jax.experimental.pallas import tpu as pltpu


def make_positional_encoding(embed_dim: int, max_len: int = 5000) -> jnp.ndarray:
    """Deterministic sinusoidal PE table, identical to the PyTorch __init__."""
    position = jnp.arange(max_len, dtype=jnp.float32)[:, None]          # (max_len, 1)
    div_term = jnp.exp(
        jnp.arange(0, embed_dim, 2, dtype=jnp.float32)
        * (-jnp.log(10000.0) / embed_dim)
    )                                                                    # (embed_dim//2,)
    pe = jnp.zeros((max_len, embed_dim), dtype=jnp.float32)
    pe = pe.at[:, 0::2].set(jnp.sin(position * div_term))
    pe = pe.at[:, 1::2].set(jnp.cos(position * div_term))
    return pe                                                            # (max_len, embed_dim)


def _add_pe_kernel(x_ref, pe_ref, o_ref):
    # x_ref / o_ref: (tB, tC) tile; pe_ref: (1, tC) tile.
    # Same-dtype, same-lane add; pe broadcasts along the sublane axis only.
    # tC is a multiple of 128 -> unmasked full-lane stores.
    o_ref[...] = x_ref[...] + pe_ref[...]


_LANE = 128
_SUBLANE = 8
_TARGET_BLOCK_BYTES = 2 * 1024 * 1024   # ~2 MiB per x block (x2 dbl-buf + out + pe << 32 MiB)
_MAX_BATCH_TILE = 512                   # tile batch only above this (multiple of 8)


def positional_encoding_forward(x: jnp.ndarray, pe: jnp.ndarray,
                                *, min_pallas_bytes: int = 0) -> jnp.ndarray:
    """x: (B, S, D); pe: (max_len, D). Returns x + pe[None, :S, :]."""
    B, S, D = x.shape
    if S > pe.shape[0]:
        raise ValueError(f"sequence length {S} exceeds PE table length {pe.shape[0]}")

    # Pre-cast pe so the kernel is a pure same-dtype add (no per-element casts,
    # half the pe DMA bytes when x is bf16).
    pe_slice = pe[:S, :].astype(x.dtype)                                 # (S, D)

    itemsize = x.dtype.itemsize
    C = S * D                                                            # fused seq*embed lane axis

    # Dispatch: below the threshold, or when the fused trailing axis cannot be
    # made lane-dense, a fused XLA add is strictly better than a kernel launch.
    if (x.size * itemsize < min_pallas_bytes) or (C % _LANE != 0):
        return x + pe_slice[None, :, :]

    # Lane-dense layout plumbing (free reshapes of contiguous trailing dims).
    x2 = x.reshape(B, C)
    pe2 = pe_slice.reshape(1, C)

    # Batch tile: full B for ordinary batch sizes (exact-dim block, no (8,128)
    # constraint), sublane-aligned chunks only for very large batches so the
    # per-block VMEM footprint stays bounded.
    if B <= _MAX_BATCH_TILE:
        tB = B
    else:
        tB = _MAX_BATCH_TILE  # multiple of 8; Pallas masks the ragged last block

    # Lane-tile size: ~2 MiB per x block, multiple of 128 lanes, capped at C.
    tC = (_TARGET_BLOCK_BYTES // max(tB * itemsize, 1)) // _LANE * _LANE
    tC = max(_LANE, min(C, tC))

    # Grid: lane-axis outer, batch-axis inner -> the pe block index (depends
    # only on the lane axis) is constant across the inner loop, so pe is
    # fetched once per lane tile, not once per (lane, batch) tile.
    grid = (pl.cdiv(C, tC), pl.cdiv(B, tB))

    out2 = pl.pallas_call(
        _add_pe_kernel,
        out_shape=jax.ShapeDtypeStruct((B, C), x.dtype),
        grid_spec=pl.GridSpec(
            grid=grid,
            in_specs=[
                pl.BlockSpec((tB, tC), lambda ci, bi: (bi, ci)),   # x tile
                pl.BlockSpec((1, tC), lambda ci, bi: (0, ci)),     # matching pe tile
            ],
            out_specs=pl.BlockSpec((tB, tC), lambda ci, bi: (bi, ci)),
        ),
        compiler_params=pltpu.CompilerParams(
            dimension_semantics=("parallel", "parallel"),          # shardable across TCs
            vmem_limit_bytes=32 * 1024 * 1024,
        ),
        cost_estimate=pl.CostEstimate(
            flops=B * C,
            transcendentals=0,
            bytes_accessed=(2 * B * C + C) * itemsize,
        ),
    )(x2, pe2)

    return out2.reshape(B, S, D)


if __name__ == "__main__":
    # Small shapes consistent with the module: batch=2, seq=8, embed_dim=32.
    B, S, D = 2, 8, 32
    MAX_LEN = 64

    key = jax.random.PRNGKey(0)
    x = jax.random.normal(key, (B, S, D), dtype=jnp.float32)

    pe = make_positional_encoding(D, max_len=MAX_LEN)

    out = positional_encoding_forward(x, pe)
    out = jax.block_until_ready(out)

    # Correctness check against the plain-JAX reference of the PyTorch forward.
    ref = x + pe[None, :S, :]
    assert out.shape == (B, S, D)
    assert jnp.allclose(out, ref, atol=1e-6, rtol=1e-6), "mismatch vs reference"

    print("KERNEL_OK")
</pallas_src>

<mosaic_0001>
module attributes {stable_mosaic.version = 11 : i64} {
  func.func @_add_pe_kernel(%arg0: i32, %arg1: i32, %arg2: memref<2x256xf32, #tpu.memory_space<vmem>>, %arg3: memref<1x256xf32, #tpu.memory_space<vmem>>, %arg4: memref<2x256xf32, #tpu.memory_space<vmem>>) attributes {dimension_semantics = [#tpu.dimension_semantics<parallel>, #tpu.dimension_semantics<parallel>], iteration_bounds = array<i64: 1, 1>, scalar_prefetch = 0 : i64, scratch_operands = 0 : i64, tpu.core_type = #tpu.core_type<tc>, window_params = [{transform_indices = @transform_0, window_bounds = array<i64: 2, 256>}, {transform_indices = @transform_1, window_bounds = array<i64: 1, 256>}, {transform_indices = @transform_2, window_bounds = array<i64: 2, 256>}]} {
    %c0 = arith.constant 0 : index
    %c0_0 = arith.constant 0 : index
    %0 = vector.load %arg2[%c0, %c0_0] : memref<2x256xf32, #tpu.memory_space<vmem>>, vector<2x256xf32>
    %c0_1 = arith.constant 0 : index
    %c0_2 = arith.constant 0 : index
    %1 = vector.load %arg3[%c0_1, %c0_2] : memref<1x256xf32, #tpu.memory_space<vmem>>, vector<1x256xf32>
    %2 = vector.broadcast %1 : vector<1x256xf32> to vector<2x256xf32>
    %3 = arith.addf %0, %2 : vector<2x256xf32>
    %c0_3 = arith.constant 0 : index
    %c0_4 = arith.constant 0 : index
    %4 = vector.load %arg4[%c0_3, %c0_4] : memref<2x256xf32, #tpu.memory_space<vmem>>, vector<2x256xf32>
    tpu.vector_store %arg4[%c0_3, %c0_4], %3 {strides = array<i32>} : memref<2x256xf32, #tpu.memory_space<vmem>>, vector<2x256xf32>,
    return
  }
  func.func @transform_0(%arg0: i32, %arg1: i32) -> (i32, i32) {
    %c0_i32 = arith.constant 0 : i32
    return %arg1, %arg0 : i32, i32
  }
  func.func @transform_1(%arg0: i32, %arg1: i32) -> (i32, i32) {
    %c0_i32 = arith.constant 0 : i32
    %c0_i32_0 = arith.constant 0 : i32
    return %c0_i32, %arg0 : i32, i32
  }
  func.func @transform_2(%arg0: i32, %arg1: i32) -> (i32, i32) {
    %c0_i32 = arith.constant 0 : i32
    return %arg1, %arg0 : i32, i32
  }
}

</mosaic_0001>

<bundles_post_ra>
// kernel: tpu_custom_call.1
= control target key start
LH: loop header
LB: loop body
LE: loop exit
PB: predicated region body
PF: predicated region fallthrough
CT: control target
= control target key end

     0   :  { %7 = vsyncpa [#allocation3], 0  ;;  %s177_s0 = inlined_call_operand.hbm [shape: f32[2,256], index: 0, kind: input, shape index: {}]   ;;  %s178_s1 = inlined_call_operand.hbm [shape: f32[1,256], index: 1, kind: input, shape index: {}]   ;;  %s179_s2 = inlined_call_operand.hbm [shape: f32[2,256], index: 2, kind: output, shape index: {}]  }
   0x1   :  { %8 = vsyncpa [#allocation6], 0 }
   0x2   :  { %9 = vsyncpa [#allocation4], 0  ;;  %s15_s11 = sshll.u32 %s177_s0, 4  ;;  %s150_s12 = smov [#allocation2]   ;;  %s16_s11 = int_to_ptr.hbm [resolvable:$true] %s15_s11 }
   0x3   :  { %s17_s13 = sshll.u32 %s150_s12, 4  ;;  %s26_s16 = sshll.u32 %s178_s1, 4  ;;  %s18_s13 = int_to_ptr.vmem [resolvable:$true] %s17_s13  ;;  %s27_s16 = int_to_ptr.hbm [resolvable:$true] %s26_s16 }
   0x4   :  { %20 = dma.hbm_to_vmem [thread:$0]  %s16_s11, 64, %s18_s13, [#allocation3]  }
   0x5   :  { %s151_s17 = smov [#allocation5]  }
   0x6   :  { %s28_s18 = sshll.u32 %s151_s17, 4  ;;  %s29_s18 = int_to_ptr.vmem [resolvable:$true] %s28_s18 }
   0x7   :  { %31 = dma.hbm_to_vmem [thread:$0]  %s27_s16, 32, %s29_s18, [#allocation6]  }
   0x8   :  { %144 = dma.done.wait [#allocation3], 64  }
   0x9   :  { %145 = vsyncadd [#allocation3], 4294967232 }
   0xa   :  { %146 = dma.done.wait [#allocation6], 32  }
   0xb   :  { %147 = vsyncadd [#allocation6], 4294967264  ;;  %v41_v0 = vld [vmem:[#allocation5] sm:$0x3]  ;;  %vm46_vm0 = vcmask 1041408   ;;  %s152_s0 = smov [#allocation7]  }
   0xc   :  { %v43_v1 = vperm.slane %v41_v0, 0  ;;  %v44_v2 = vperm.slane %v41_v0, 1  ;;  %v40_v3 = vld [vmem:[#allocation2] sm:$0xf]  ;;  %s56_s19 = sshll.u32 %s152_s0, 4  ;;  %s58_s21 = sshll.u32 %s179_s2, 4  ;;  %s57_s19 = int_to_ptr.vmem [resolvable:$true] %s56_s19  ;;  %s59_s21 = int_to_ptr.hbm [resolvable:$true] %s58_s21 }
   0xe   :  { %v45_v4 = vrot.slane %v44_v2, 6 }
  0x10   :  { %v47_v5 = vsel %vm46_vm0, %v43_v1, %v45_v4 }
  0x11   :  { %v49_v6 = vadd.f32 %v47_v5, %v40_v3 }
  0x13   :  { %50 = vst [vmem:[#allocation7] sm:$0xf] %v49_v6 }
  0x14   :  { %61 = dma.vmem_to_hbm [thread:$0]  %s57_s19, 64, %s59_s21, [#allocation4]  }
  0x15   :  { %148 = dma.done.wait [#allocation4], 64  }
  0x16   :  { %149 = vsyncadd [#allocation4], 4294967232 }
  0x17   :  { %66 = vsyncpa [#allocation3], 1 }
  0x18   :  { %67 = vsyncpa [#allocation6], 1 }
  0x19   :  { %68 = vsyncpa [#allocation4], 1 }

</bundles_post_ra>
